<compile_context>
chip_gen: v7x
topology: tpu7x:2x2x1
jax: 0.10.0
libtpu: 0.0.40
codegen_flags: <defaults>
</compile_context>

<pallas_src>
import jax
import jax.numpy as jnp
from jax.experimental import pallas as pl
from jax.experimental.pallas import tpu as pltpu


def _round_up(n, m):
    return ((n + m - 1) // m) * m


def _cdiv(a, b):
    return -(-a // b)


# --------------------------------------------------------------------------- #
# Kernel
# --------------------------------------------------------------------------- #
def _mlp_kernel(x_ref, w1_ref, b1_ref, w2_ref, b2_ref, w3_ref, b3_ref, o_ref):
    # Layer 1: (TB, D)bf16 @ (D, 1024)bf16 -> f32 accum; bias + ReLU in f32.
    x = x_ref[...]
    if x.dtype != jnp.bfloat16:          # trace-time branch: bf16 x streams as-is
        x = x.astype(jnp.bfloat16)
    h1 = jnp.dot(x, w1_ref[...], preferred_element_type=jnp.float32)
    h1 = jnp.maximum(h1 + b1_ref[...], 0.0)
    # Dropout(0.5) -> identity in eval mode.

    # Layer 2: (TB, 1024)bf16 @ (1024, 256)bf16 -> f32 accum; bias + ReLU in f32.
    h2 = jnp.dot(h1.astype(jnp.bfloat16), w2_ref[...],
                 preferred_element_type=jnp.float32)
    h2 = jnp.maximum(h2 + b2_ref[...], 0.0)
    # Dropout(0.3) -> identity in eval mode.

    # Layer 3: (TB, 256)bf16 @ (256, Cpad)bf16 -> f32 accum; bias in f32.
    out = jnp.dot(h2.astype(jnp.bfloat16), w3_ref[...],
                  preferred_element_type=jnp.float32)
    o_ref[...] = (out + b3_ref[...]).astype(o_ref.dtype)


# --------------------------------------------------------------------------- #
# One-time parameter preparation (hoisted out of the per-call path)
# --------------------------------------------------------------------------- #
def prepare_params(params):
    """Convert raw f32 params into kernel-ready form. Call ONCE and reuse.

    - w1/w2/w3 cast to bf16 (halves resident weight bytes, feeds bf16 MXU).
    - biases normalized to f32 row vectors (1, N).
    - final layer padded with zero class columns up to a multiple of 128 so the
      output tile is lane-dense (unmasked vector stores).
    """
    w1, w2, w3 = params["w1"], params["w2"], params["w3"]
    assert w1.ndim == 2 and w1.shape[1] == 1024, "w1 must be (input_dim, 1024)"
    assert w2.shape == (1024, 256), "w2 must be (1024, 256)"
    assert w3.ndim == 2 and w3.shape[0] == 256, "w3 must be (256, num_classes)"

    def _bias(b, n):
        b = jnp.asarray(b, jnp.float32).reshape(1, -1)
        assert b.shape[1] == n, f"bias has {b.shape[1]} features, expected {n}"
        return b

    C = int(w3.shape[1])
    C_pad = _round_up(C, 128)
    b3 = _bias(params["b3"], C)
    if C_pad != C:
        w3 = jnp.pad(w3, ((0, 0), (0, C_pad - C)))
        b3 = jnp.pad(b3, ((0, 0), (0, C_pad - C)))

    return {
        "w1": jnp.asarray(w1, jnp.bfloat16),
        "b1": _bias(params["b1"], 1024),
        "w2": jnp.asarray(w2, jnp.bfloat16),
        "b2": _bias(params["b2"], 256),
        "w3": jnp.asarray(w3, jnp.bfloat16),
        "b3": b3,
        "num_classes": C,
    }


# --------------------------------------------------------------------------- #
# Sizing helpers
# --------------------------------------------------------------------------- #
def _vmem_budget_bytes():
    """~85% of physical per-core VMEM (headroom for compiler scratch)."""
    phys = 64 * 1024 * 1024  # conservative default: v7x per-TensorCore VMEM
    try:
        info = pltpu.get_tpu_info()
        phys = int(getattr(info, "vmem_capacity_bytes", phys)) or phys
    except Exception:
        pass
    return int(phys * 0.85)


def _choose_tb(B, block_b):
    """Batch tile: multiple of 8, as large as block_b, >=2 grid steps when the
    batch can be split (keeps v7x's second TensorCore busy), balanced tiles."""
    B8 = _round_up(max(B, 1), 8)
    max_tb = min(block_b, B8)
    n = _cdiv(B8, max_tb)
    if n == 1 and B8 >= 16:
        n = 2
    return _round_up(_cdiv(B8, n), 8)


def _vmem_needed_bytes(TB, D, C_pad, x_itemsize, resident_bytes):
    stream = 2 * TB * D * x_itemsize + 2 * TB * C_pad * 4      # dbl-buffered x / out
    interm = TB * (D * 2 + 1024 * (4 + 2) + 256 * (4 + 2) + C_pad * 4)
    return resident_bytes + stream + interm


# --------------------------------------------------------------------------- #
# Forward
# --------------------------------------------------------------------------- #
def base_model_forward(x, prepared, *, block_b=512):
    """x: (B, input_dim), f32 or bf16. prepared: output of prepare_params()."""
    B, D = x.shape
    C = prepared["num_classes"]
    w1, b1 = prepared["w1"], prepared["b1"]
    w2, b2 = prepared["w2"], prepared["b2"]
    w3, b3 = prepared["w3"], prepared["b3"]
    assert w1.shape[0] == D, f"input_dim mismatch: x has {D}, w1 has {w1.shape[0]}"
    C_pad = int(w3.shape[1])

    budget = _vmem_budget_bytes()
    resident_bytes = sum(int(a.size) * a.dtype.itemsize
                         for a in (w1, b1, w2, b2, w3, b3))
    if resident_bytes > budget:
        # TODO(synk): K-tiled accumulator path for very large input_dim where
        # w1 alone overflows VMEM; not needed at these sizes.
        raise NotImplementedError(
            f"resident weights ({resident_bytes} B) exceed VMEM budget "
            f"({budget} B); a K-tiled layer-1 path is required.")

    x_itemsize = jnp.dtype(x.dtype).itemsize
    TB = _choose_tb(B, block_b)
    while TB > 8 and _vmem_needed_bytes(TB, D, C_pad, x_itemsize,
                                        resident_bytes) > budget:
        TB = max(8, _round_up(TB // 2, 8))
    needed = _vmem_needed_bytes(TB, D, C_pad, x_itemsize, resident_bytes)
    vmem_limit = int(min(budget, max(2 * needed, 32 * 1024 * 1024)))

    # No padding of x: Pallas masks the ragged edge tile (rows independent).
    grid = (_cdiv(B, TB),)

    def batch_spec(cols):
        return pl.BlockSpec((TB, cols), lambda i: (i, 0))

    def resident_spec():
        # Whole array placed in VMEM once, reused by every batch tile
        # (single DMA, no double buffering).
        return pl.BlockSpec(memory_space=pltpu.MemorySpace.VMEM)

    flops = 2 * B * (D * 1024 + 1024 * 256 + 256 * C_pad)
    bytes_accessed = int(x.size * x_itemsize + resident_bytes + B * C_pad * 4)

    out = pl.pallas_call(
        _mlp_kernel,
        out_shape=jax.ShapeDtypeStruct((B, C_pad), jnp.float32),
        grid_spec=pltpu.PrefetchScalarGridSpec(
            num_scalar_prefetch=0,
            grid=grid,
            in_specs=[
                batch_spec(D),      # x tiles pipeline over the batch
                resident_spec(),    # w1
                resident_spec(),    # b1
                resident_spec(),    # w2
                resident_spec(),    # b2
                resident_spec(),    # w3 (class-padded)
                resident_spec(),    # b3 (class-padded)
            ],
            out_specs=batch_spec(C_pad),
        ),
        compiler_params=pltpu.CompilerParams(
            dimension_semantics=("parallel",),   # v7x: split batch across TCs
            vmem_limit_bytes=vmem_limit,
        ),
        cost_estimate=pl.CostEstimate(
            flops=flops, transcendentals=0, bytes_accessed=bytes_accessed),
    )(x, w1, b1, w2, b2, w3, b3)

    return out[:, :C]


# --------------------------------------------------------------------------- #
# Init + reference + demo
# --------------------------------------------------------------------------- #
def init_params(key, input_dim, num_classes):
    """Deterministic init matching PyTorch Linear default (uniform ±1/sqrt(fan_in))."""
    dims = [(input_dim, 1024), (1024, 256), (256, num_classes)]
    params = {}
    for idx, (fan_in, fan_out) in enumerate(dims, start=1):
        key, kw, kb = jax.random.split(key, 3)
        bound = 1.0 / (fan_in ** 0.5)
        params[f"w{idx}"] = jax.random.uniform(
            kw, (fan_in, fan_out), jnp.float32, minval=-bound, maxval=bound)
        params[f"b{idx}"] = jax.random.uniform(
            kb, (1, fan_out), jnp.float32, minval=-bound, maxval=bound)
    return params


def _reference(x, params):
    """Pure-JAX reference with the same bf16-weight / f32-accumulate numerics."""
    w1 = params["w1"].astype(jnp.bfloat16)
    w2 = params["w2"].astype(jnp.bfloat16)
    w3 = params["w3"].astype(jnp.bfloat16)
    h1 = jnp.dot(x.astype(jnp.bfloat16), w1, preferred_element_type=jnp.float32)
    h1 = jnp.maximum(h1 + params["b1"], 0.0)
    h2 = jnp.dot(h1.astype(jnp.bfloat16), w2, preferred_element_type=jnp.float32)
    h2 = jnp.maximum(h2 + params["b2"], 0.0)
    out = jnp.dot(h2.astype(jnp.bfloat16), w3, preferred_element_type=jnp.float32)
    return out + params["b3"]


if __name__ == "__main__":
    INPUT_DIM = 32
    NUM_CLASSES = 10
    BATCH = 8

    key = jax.random.PRNGKey(0)
    key, kx = jax.random.split(key)
    x = jax.random.normal(kx, (BATCH, INPUT_DIM), jnp.float32)
    raw_params = init_params(key, INPUT_DIM, NUM_CLASSES)

    prepared = prepare_params(raw_params)   # one-time bf16 cast + class padding

    out = base_model_forward(x, prepared)
    out = jax.block_until_ready(out)

    ref = _reference(x, raw_params)
    assert out.shape == (BATCH, NUM_CLASSES)
    assert jnp.allclose(out, ref, atol=1e-2, rtol=1e-2), (
        f"max abs err = {jnp.max(jnp.abs(out - ref))}")

    print("KERNEL_OK")
</pallas_src>

<mosaic_0001>
module attributes {stable_mosaic.version = 11 : i64} {
  func.func @_mlp_kernel(%arg0: i32, %arg1: memref<8x32xf32, #tpu.memory_space<vmem>>, %arg2: memref<32x1024xbf16, #tpu.memory_space<vmem>>, %arg3: memref<1x1024xf32, #tpu.memory_space<vmem>>, %arg4: memref<1024x256xbf16, #tpu.memory_space<vmem>>, %arg5: memref<1x256xf32, #tpu.memory_space<vmem>>, %arg6: memref<256x128xbf16, #tpu.memory_space<vmem>>, %arg7: memref<1x128xf32, #tpu.memory_space<vmem>>, %arg8: memref<8x128xf32, #tpu.memory_space<vmem>>) attributes {dimension_semantics = [#tpu.dimension_semantics<parallel>], iteration_bounds = array<i64: 1>, scalar_prefetch = 0 : i64, scratch_operands = 0 : i64, tpu.core_type = #tpu.core_type<tc>, window_params = [{transform_indices = @transform_0, window_bounds = array<i64: 8, 32>}, {pipeline_mode = #tpu.pipeline_mode<synchronous>, transform_indices = @transform_1, window_bounds = array<i64: 32, 1024>}, {pipeline_mode = #tpu.pipeline_mode<synchronous>, transform_indices = @transform_2, window_bounds = array<i64: 1, 1024>}, {pipeline_mode = #tpu.pipeline_mode<synchronous>, transform_indices = @transform_3, window_bounds = array<i64: 1024, 256>}, {pipeline_mode = #tpu.pipeline_mode<synchronous>, transform_indices = @transform_4, window_bounds = array<i64: 1, 256>}, {pipeline_mode = #tpu.pipeline_mode<synchronous>, transform_indices = @transform_5, window_bounds = array<i64: 256, 128>}, {pipeline_mode = #tpu.pipeline_mode<synchronous>, transform_indices = @transform_6, window_bounds = array<i64: 1, 128>}, {transform_indices = @transform_7, window_bounds = array<i64: 8, 128>}]} {
    %c0 = arith.constant 0 : index
    %c0_0 = arith.constant 0 : index
    %0 = vector.load %arg1[%c0, %c0_0] : memref<8x32xf32, #tpu.memory_space<vmem>>, vector<8x32xf32>
    %1 = arith.truncf %0 : vector<8x32xf32> to vector<8x32xbf16>
    %c0_1 = arith.constant 0 : index
    %c0_2 = arith.constant 0 : index
    %2 = vector.load %arg2[%c0_1, %c0_2] : memref<32x1024xbf16, #tpu.memory_space<vmem>>, vector<32x1024xbf16>
    %cst = arith.constant dense<0.000000e+00> : vector<8x1024xf32>
    %3 = tpu.matmul %1, %2, %cst {dimension_numbers = #tpu.dot_dimension_numbers<[1], [0], [0], [1], [0, 0, 1, 1], [], []>} : vector<8x32xbf16>, vector<32x1024xbf16>, vector<8x1024xf32> -> vector<8x1024xf32>
    %c0_3 = arith.constant 0 : index
    %c0_4 = arith.constant 0 : index
    %4 = vector.load %arg3[%c0_3, %c0_4] : memref<1x1024xf32, #tpu.memory_space<vmem>>, vector<1x1024xf32>
    %5 = vector.broadcast %4 : vector<1x1024xf32> to vector<8x1024xf32>
    %6 = arith.addf %3, %5 : vector<8x1024xf32>
    %cst_5 = arith.constant 0.000000e+00 : f32
    %7 = vector.broadcast %cst_5 : f32 to vector<8x1024xf32>
    %8 = arith.maximumf %6, %7 : vector<8x1024xf32>
    %9 = arith.truncf %8 : vector<8x1024xf32> to vector<8x1024xbf16>
    %c0_6 = arith.constant 0 : index
    %c0_7 = arith.constant 0 : index
    %10 = vector.load %arg4[%c0_6, %c0_7] : memref<1024x256xbf16, #tpu.memory_space<vmem>>, vector<1024x256xbf16>
    %cst_8 = arith.constant dense<0.000000e+00> : vector<8x256xf32>
    %11 = tpu.matmul %9, %10, %cst_8 {dimension_numbers = #tpu.dot_dimension_numbers<[1], [0], [0], [1], [0, 0, 1, 1], [], []>} : vector<8x1024xbf16>, vector<1024x256xbf16>, vector<8x256xf32> -> vector<8x256xf32>
    %c0_9 = arith.constant 0 : index
    %c0_10 = arith.constant 0 : index
    %12 = vector.load %arg5[%c0_9, %c0_10] : memref<1x256xf32, #tpu.memory_space<vmem>>, vector<1x256xf32>
    %13 = vector.broadcast %12 : vector<1x256xf32> to vector<8x256xf32>
    %14 = arith.addf %11, %13 : vector<8x256xf32>
    %cst_11 = arith.constant 0.000000e+00 : f32
    %15 = vector.broadcast %cst_11 : f32 to vector<8x256xf32>
    %16 = arith.maximumf %14, %15 : vector<8x256xf32>
    %17 = arith.truncf %16 : vector<8x256xf32> to vector<8x256xbf16>
    %c0_12 = arith.constant 0 : index
    %c0_13 = arith.constant 0 : index
    %18 = vector.load %arg6[%c0_12, %c0_13] : memref<256x128xbf16, #tpu.memory_space<vmem>>, vector<256x128xbf16>
    %cst_14 = arith.constant dense<0.000000e+00> : vector<8x128xf32>
    %19 = tpu.matmul %17, %18, %cst_14 {dimension_numbers = #tpu.dot_dimension_numbers<[1], [0], [0], [1], [0, 0, 1, 1], [], []>} : vector<8x256xbf16>, vector<256x128xbf16>, vector<8x128xf32> -> vector<8x128xf32>
    %c0_15 = arith.constant 0 : index
    %c0_16 = arith.constant 0 : index
    %20 = vector.load %arg7[%c0_15, %c0_16] : memref<1x128xf32, #tpu.memory_space<vmem>>, vector<1x128xf32>
    %21 = vector.broadcast %20 : vector<1x128xf32> to vector<8x128xf32>
    %22 = arith.addf %19, %21 : vector<8x128xf32>
    %c0_17 = arith.constant 0 : index
    %c0_18 = arith.constant 0 : index
    %23 = vector.load %arg8[%c0_17, %c0_18] : memref<8x128xf32, #tpu.memory_space<vmem>>, vector<8x128xf32>
    tpu.vector_store %arg8[%c0_17, %c0_18], %22 {strides = array<i32>} : memref<8x128xf32, #tpu.memory_space<vmem>>, vector<8x128xf32>,
    return
  }
  func.func @transform_0(%arg0: i32) -> (i32, i32) {
    %c0_i32 = arith.constant 0 : i32
    %c0_i32_0 = arith.constant 0 : i32
    return %arg0, %c0_i32 : i32, i32
  }
  func.func @transform_1(%arg0: i32) -> (i32, i32) {
    %c0_i32 = arith.constant 0 : i32
    %c0_i32_0 = arith.constant 0 : i32
    %c0_i32_1 = arith.constant 0 : i32
    return %c0_i32, %c0_i32_0 : i32, i32
  }
  func.func @transform_2(%arg0: i32) -> (i32, i32) {
    %c0_i32 = arith.constant 0 : i32
    %c0_i32_0 = arith.constant 0 : i32
    %c0_i32_1 = arith.constant 0 : i32
    return %c0_i32, %c0_i32_0 : i32, i32
  }
  func.func @transform_3(%arg0: i32) -> (i32, i32) {
    %c0_i32 = arith.constant 0 : i32
    %c0_i32_0 = arith.constant 0 : i32
    %c0_i32_1 = arith.constant 0 : i32
    return %c0_i32, %c0_i32_0 : i32, i32
  }
  func.func @transform_4(%arg0: i32) -> (i32, i32) {
    %c0_i32 = arith.constant 0 : i32
    %c0_i32_0 = arith.constant 0 : i32
    %c0_i32_1 = arith.constant 0 : i32
    return %c0_i32, %c0_i32_0 : i32, i32
  }
  func.func @transform_5(%arg0: i32) -> (i32, i32) {
    %c0_i32 = arith.constant 0 : i32
    %c0_i32_0 = arith.constant 0 : i32
    %c0_i32_1 = arith.constant 0 : i32
    return %c0_i32, %c0_i32_0 : i32, i32
  }
  func.func @transform_6(%arg0: i32) -> (i32, i32) {
    %c0_i32 = arith.constant 0 : i32
    %c0_i32_0 = arith.constant 0 : i32
    %c0_i32_1 = arith.constant 0 : i32
    return %c0_i32, %c0_i32_0 : i32, i32
  }
  func.func @transform_7(%arg0: i32) -> (i32, i32) {
    %c0_i32 = arith.constant 0 : i32
    %c0_i32_0 = arith.constant 0 : i32
    return %arg0, %c0_i32 : i32, i32
  }
}

</mosaic_0001>

<bundles_post_ra>
// kernel: tpu_custom_call.1
= control target key start
LH: loop header
LB: loop body
LE: loop exit
PB: predicated region body
PF: predicated region fallthrough
CT: control target
= control target key end

     0   :  { %12 = vsyncpa [#allocation3], 0  ;;  %s2296_s0 = inlined_call_operand.hbm [shape: f32[8,32], index: 0, kind: input, shape index: {}]   ;;  %s2297_s1 = inlined_call_operand.hbm [shape: bf16[32,1024], index: 1, kind: input, shape index: {}]   ;;  %s2298_s2 = inlined_call_operand.hbm [shape: f32[1,1024], index: 2, kind: input, shape index: {}]   ;;  %s2299_s3 = inlined_call_operand.hbm [shape: bf16[1024,256], index: 3, kind: input, shape index: {}]   ;;  %s2300_s4 = inlined_call_operand.vmem [shape: f32[1,256], index: 4, kind: input, shape index: {}]   ;;  %s2301_s5 = inlined_call_operand.hbm [shape: bf16[256,128], index: 5, kind: input, shape index: {}]   ;;  %s2302_s6 = inlined_call_operand.vmem [shape: f32[1,128], index: 6, kind: input, shape index: {}]   ;;  %s2303_s7 = inlined_call_operand.hbm [shape: f32[8,128], index: 7, kind: output, shape index: {}]  }
   0x1   :  { %13 = vsyncpa [#allocation6], 0 }
   0x2   :  { %14 = vsyncpa [#allocation9], 0 }
   0x3   :  { %15 = vsyncpa [#allocation4], 0  ;;  %s2117_s24 = smov [#allocation5]   ;;  %s1977_s28 = scalar_lea.hbm %s2297_s1, 2048 }
   0x4   :  { %s31_s25 = sshll.u32 %s2117_s24, 4  ;;  %p1978_p0 = scmp.ne.s32.totalorder %s2297_s1, %s1977_s28  ;;  %s32_s25 = int_to_ptr.vmem [resolvable:$true] %s31_s25 }
   0x5   :  { %p1981_p1 = scmp.lt.u32.totalorder %s1977_s28, %s2297_s1 }
   0x7   :  { %p1983_p2 = pnand %p1981_p1, %p1978_p0 }
   0x9   :  { %1986 = shalt.err (!%p1983_p2)
}
   0xa   :  { %s1987_s10 = scalar_lea.vmem %s32_s25, 2048  ;;  %p1992_p4 = scmp.lt.s32.totalorder %s32_s25, %s32_s25 }
   0xb   :  { %p1988_p3 = scmp.ne.s32.totalorder %s32_s25, %s1987_s10  ;;  %p1993_p5 = scmp.lt.s32.totalorder %s1987_s10, %s1987_s10 }
   0xd   :  { %p1994_p6 = por %p1993_p5, %p1992_p4 }
   0xf   :  { %p1995_p7 = pnand %p1994_p6, %p1988_p3 }
  0x11   :  { %1998 = shalt.err (!%p1995_p7)
}
  0x12   :  { %s2118_s11 = smov 512   ;;  %s2119_s12 = smov 32  }
  0x13   :  { %37 = dma.hbm_to_vmem [thread:$0]  %s2297_s1, 2048, %s32_s25, [#allocation6], %s2118_s11, %s2118_s11, %s2119_s12  }
  0x14   :  { %s2120_s15 = smov [#allocation8]   ;;  %s1999_s19 = scalar_lea.hbm %s2299_s3, 16384 }
  0x15   :  { %s53_s16 = sshll.u32 %s2120_s15, 4  ;;  %p2000_p8 = scmp.ne.s32.totalorder %s2299_s3, %s1999_s19  ;;  %s54_s16 = int_to_ptr.vmem [resolvable:$true] %s53_s16 }
  0x16   :  { %p2003_p9 = scmp.lt.u32.totalorder %s1999_s19, %s2299_s3 }
  0x18   :  { %p2005_p10 = pnand %p2003_p9, %p2000_p8 }
  0x1a   :  { %2008 = shalt.err (!%p2005_p10)
}
  0x1b   :  { %s2009_s24 = scalar_lea.vmem %s54_s16, 16384  ;;  %p2014_p12 = scmp.lt.s32.totalorder %s54_s16, %s54_s16 }
  0x1c   :  { %p2010_p11 = scmp.ne.s32.totalorder %s54_s16, %s2009_s24  ;;  %p2015_p13 = scmp.lt.s32.totalorder %s2009_s24, %s2009_s24 }
  0x1e   :  { %p2016_p0 = por %p2015_p13, %p2014_p12 }
  0x20   :  { %p2017_p1 = pnand %p2016_p0, %p2010_p11 }
  0x22   :  { %2020 = shalt.err (!%p2017_p1)
}
  0x23   :  { %s2121_s1 = smov 128   ;;  %s2122_s25 = smov 8  }
  0x24   :  { %59 = dma.hbm_to_vmem [thread:$0]  %s2299_s3, 16384, %s54_s16, [#allocation9], %s2121_s1, %s2121_s1, %s2122_s25  }
  0x25   :  { %s2123_s28 = smov [#allocation2]   ;;  %s2124_s30 = smov [#allocation7]  }
  0x26   :  { %s22_s29 = sshll.u32 %s2123_s28, 4  ;;  %s44_s8 = sshll.u32 %s2124_s30, 4  ;;  %s23_s29 = int_to_ptr.vmem [resolvable:$true] %s22_s29  ;;  %s45_s8 = int_to_ptr.vmem [resolvable:$true] %s44_s8 }
  0x27   :  { %s2021_s11 = scalar_lea.hbm %s2296_s0, 128 }
  0x28   :  { %p2022_p2 = scmp.ne.s32.totalorder %s2296_s0, %s2021_s11  ;;  %p2025_p3 = scmp.lt.u32.totalorder %s2021_s11, %s2296_s0 }
  0x2a   :  { %p2027_p4 = pnand %p2025_p3, %p2022_p2 }
  0x2c   :  { %2030 = shalt.err (!%p2027_p4)
}
  0x2d   :  { %s2031_s3 = scalar_lea.vmem %s23_s29, 128  ;;  %p2036_p6 = scmp.lt.s32.totalorder %s23_s29, %s23_s29 }
  0x2e   :  { %p2032_p5 = scmp.ne.s32.totalorder %s23_s29, %s2031_s3  ;;  %p2037_p7 = scmp.lt.s32.totalorder %s2031_s3, %s2031_s3 }
  0x30   :  { %p2038_p8 = por %p2037_p7, %p2036_p6 }
  0x32   :  { %p2039_p9 = pnand %p2038_p8, %p2032_p5 }
  0x34   :  { %2042 = shalt.err (!%p2039_p9)
}
  0x35   :  { %25 = dma.hbm_to_vmem [thread:$0]  %s2296_s0, 128, %s23_s29, [#allocation3]  }
  0x36   :  { %s2043_s20 = scalar_lea.hbm %s2298_s2, 128 }
  0x37   :  { %p2044_p10 = scmp.ne.s32.totalorder %s2298_s2, %s2043_s20  ;;  %p2047_p11 = scmp.lt.u32.totalorder %s2043_s20, %s2298_s2 }
  0x39   :  { %p2049_p12 = pnand %p2047_p11, %p2044_p10 }
  0x3b   :  { %2052 = shalt.err (!%p2049_p12)
}
  0x3c   :  { %s2053_s1 = scalar_lea.vmem %s45_s8, 128  ;;  %p2058_p0 = scmp.lt.s32.totalorder %s45_s8, %s45_s8 }
  0x3d   :  { %p2054_p13 = scmp.ne.s32.totalorder %s45_s8, %s2053_s1  ;;  %p2059_p1 = scmp.lt.s32.totalorder %s2053_s1, %s2053_s1 }
  0x3f   :  { %p2060_p2 = por %p2059_p1, %p2058_p0 }
  0x41   :  { %p2061_p3 = pnand %p2060_p2, %p2054_p13 }
  0x43   :  { %2064 = shalt.err (!%p2061_p3)
}
  0x44   :  { %47 = dma.hbm_to_vmem [thread:$0]  %s2298_s2, 128, %s45_s8, [#allocation6]  }
  0x45   :  { %s2125_s26 = smov [#allocation10]   ;;  %s2065_s30 = scalar_lea.hbm %s2301_s5, 2048 }
  0x46   :  { %s67_s27 = sshll.u32 %s2125_s26, 4  ;;  %p2066_p4 = scmp.ne.s32.totalorder %s2301_s5, %s2065_s30  ;;  %s68_s27 = int_to_ptr.vmem [resolvable:$true] %s67_s27 }
  0x47   :  { %p2069_p5 = scmp.lt.u32.totalorder %s2065_s30, %s2301_s5 }
  0x49   :  { %p2071_p6 = pnand %p2069_p5, %p2066_p4 }
  0x4b   :  { %2074 = shalt.err (!%p2071_p6)
}
  0x4c   :  { %s2075_s13 = scalar_lea.vmem %s68_s27, 2048  ;;  %p2080_p8 = scmp.lt.s32.totalorder %s68_s27, %s68_s27 }
  0x4d   :  { %p2076_p7 = scmp.ne.s32.totalorder %s68_s27, %s2075_s13  ;;  %p2081_p9 = scmp.lt.s32.totalorder %s2075_s13, %s2075_s13 }
  0x4f   :  { %p2082_p10 = por %p2081_p9, %p2080_p8 }
  0x51   :  { %p2083_p11 = pnand %p2082_p10, %p2076_p7 }
  0x53   :  { %2086 = shalt.err (!%p2083_p11)
}
  0x54   :  { %s2126_s2 = smov 64   ;;  %s2127_s8 = smov 4  }
  0x55   :  { %73 = dma.hbm_to_vmem [thread:$0]  %s2301_s5, 2048, %s68_s27, [#allocation9], %s2126_s2, %s2126_s2, %s2127_s8  }
  0x56   :  { %2109 = dma.done.wait [#allocation3], 128  }
  0x57   :  { %2110 = vsyncadd [#allocation3], 4294967168 }
  0x58   :  { %2111 = dma.done.wait [#allocation6], 2176  }
  0x59   :  { %2112 = vsyncadd [#allocation6], 4294965120 }
  0x5a   :  { %2113 = dma.done.wait [#allocation9], 18432  }
  0x5b   :  { %2114 = vsyncadd [#allocation9], 4294948864  ;;  %v2128_v0 = vmov 0   ;;  %v94_v1 = vld [vmem:[#allocation5] sm:$0xff]  ;;  %v95_v8 = vld [vmem:[#allocation5 + $0x8] sm:$0xff]  ;;  %vm232_vm0 = vcmask 261120  }
  0x5c   :  { %268 = vmatprep.mubr.bf16.mxu0 %v2128_v0  ;;  %v98_v2 = vld [vmem:[#allocation5 + $0x20] sm:$0xff]  ;;  %v99_v9 = vld [vmem:[#allocation5 + $0x28] sm:$0xff]  ;;  %v92_v11 = vld [vmem:[#allocation2] sm:$0xff]  ;;  %s2129_s17 = smov [#allocation11]  }
  0x5d   :  { %v102_v3 = vld [vmem:[#allocation5 + $0x40] sm:$0xff]  ;;  %v1558_v4 = vcombine.high %v94_v1, %v98_v2  ;;  %v1557_v5 = vcombine.low %v94_v1, %v98_v2  ;;  %v1560_v12 = vcombine.high %v95_v8, %v99_v9  ;;  %v103_v13 = vld [vmem:[#allocation5 + $0x48] sm:$0xff]  ;;  %v2231_v17 = vpack.c.bf16 %v92_v11, %v92_v11  ;;  %v96_v21 = vld [vmem:[#allocation5 + $0x10] sm:$0xff]  ;;  %s1546_s18 = sshll.u32 %s2129_s17, 4  ;;  %s1547_s18 = int_to_ptr.vmem [resolvable:$true] %s1546_s18 }
  0x5e   :  { %v106_v6 = vld [vmem:[#allocation5 + $0x60] sm:$0xff]  ;;  %v107_v14 = vld [vmem:[#allocation5 + $0x68] sm:$0xff]  ;;  %v1559_v19 = vcombine.low %v95_v8, %v99_v9  ;;  %v100_v23 = vld [vmem:[#allocation5 + $0x30] sm:$0xff]  ;;  %s2087_s19 = scalar_lea.vmem %s1547_s18, 128  ;;  %p2092_p13 = scmp.lt.s32.totalorder %s1547_s18, %s1547_s18 }
  0x5f   :  { %v1566_v7 = vcombine.high %v102_v3, %v106_v6  ;;  %236 = vmatprep.subr.bf16.mxu0 %v1558_v4  ;;  %v1565_v10 = vcombine.low %v102_v3, %v106_v6  ;;  %v1769_v15 = vld [vmem:[#allocation8 + $0x4] ss:$8 sps:$4 sm:$0xff]   ;;  %v1771_v16 = vld [vmem:[#allocation8] ss:$8 sps:$4 sm:$0xff]   ;;  %v1772_v18 = vld [vmem:[#allocation8 + $0x14] ss:$8 sps:$4 sm:$0xff]   ;;  %v1568_v20 = vcombine.high %v103_v13, %v107_v14  ;;  %v1567_v25 = vcombine.low %v103_v13, %v107_v14  ;;  %p2088_p12 = scmp.ne.s32.totalorder %s1547_s18, %s2087_s19  ;;  %p2093_p0 = scmp.lt.s32.totalorder %s2087_s19, %s2087_s19 }
  0x60   :  { %237 = vmatpush1.bf16.msra.mxu0 %v1557_v5  ;;  %1196 = vmatprep.subr.bf16.mxu1 %v1769_v15  ;;  %v1774_v22 = vld [vmem:[#allocation8 + $0x10] ss:$8 sps:$4 sm:$0xff]   ;;  %v1775_v24 = vld [vmem:[#allocation8 + $0x24] ss:$8 sps:$4 sm:$0xff]   ;;  %v1562_v27 = vcombine.high %v96_v21, %v100_v23  ;;  %v1777_v29 = vld [vmem:[#allocation8 + $0x20] ss:$8 sps:$4 sm:$0xff]   ;;  %v1561_v31 = vcombine.low %v96_v21, %v100_v23 }
  0x61   :  { %238 = vmatprep.subr.bf16.mxu0 %v1566_v7  ;;  %1197 = vmatpush1.bf16.msra.mxu1 %v1771_v16  ;;  %v104_v26 = vld [vmem:[#allocation5 + $0x50] sm:$0xff]  ;;  %v1778_v30 = vld [vmem:[#allocation8 + $0x34] ss:$8 sps:$4 sm:$0xff]   ;;  %v1780_v33 = vld [vmem:[#allocation8 + $0x30] ss:$8 sps:$4 sm:$0xff]   ;;  %p2094_p1 = por %p2093_p0, %p2092_p13 }
  0x62   :  { %1198 = vmatprep.subr.bf16.mxu1 %v1772_v18  ;;  %v108_v28 = vld [vmem:[#allocation5 + $0x70] sm:$0xff]  ;;  %v97_v34 = vld [vmem:[#allocation5 + $0x18] sm:$0xff] }
  0x63   :  { %v1570_v32 = vcombine.high %v104_v26, %v108_v28  ;;  %v101_v35 = vld [vmem:[#allocation5 + $0x38] sm:$0xff]  ;;  %v1781_v36 = vld [vmem:[#allocation8 + $0x44] ss:$8 sps:$4 sm:$0xff]   ;;  %v1569_v37 = vcombine.low %v104_v26, %v108_v28  ;;  %v1786_v41 = vld [vmem:[#allocation8 + $0x40] ss:$8 sps:$4 sm:$0xff]   ;;  %p2095_p2 = pnand %p2094_p1, %p2088_p12 }
  0x64   :  { %239 = vmatpush1.bf16.msra.mxu0 %v1565_v10  ;;  %v105_v38 = vld [vmem:[#allocation5 + $0x58] sm:$0xff]  ;;  %v1564_v39 = vcombine.high %v97_v34, %v101_v35  ;;  %v1563_v43 = vcombine.low %v97_v34, %v101_v35  ;;  %v1793_v46 = vld [vmem:[#allocation8 + $0x64] ss:$8 sps:$4 sm:$0xff]   ;;  %v1798_v49 = vld [vmem:[#allocation8 + $0x60] ss:$8 sps:$4 sm:$0xff]  }
  0x65   :  { %277 = vmatprep.subr.bf16.mxu0 %v1560_v12  ;;  %1199 = vmatpush1.bf16.msra.mxu1 %v1774_v22  ;;  %v109_v40 = vld [vmem:[#allocation5 + $0x78] sm:$0xff]  ;;  %v1785_v48 = vld [vmem:[#allocation8 + $0x204] ss:$8 sps:$4 sm:$0xff]   ;;  %v1783_v51 = vld [vmem:[#allocation8 + $0x200] ss:$8 sps:$4 sm:$0xff]  }
  0x66   :  { %1200 = vmatprep.subr.bf16.mxu1 %v1775_v24  ;;  %v1787_v42 = vld [vmem:[#allocation8 + $0x54] ss:$8 sps:$4 sm:$0xff]   ;;  %v1572_v44 = vcombine.high %v105_v38, %v109_v40  ;;  %v1792_v45 = vld [vmem:[#allocation8 + $0x50] ss:$8 sps:$4 sm:$0xff]   ;;  %v1571_v47 = vcombine.low %v105_v38, %v109_v40  ;;  %v1805_v54 = vld [vmem:[#allocation8 + $0x84] ss:$8 sps:$4 sm:$0xff]  }
  0x67   :  { %1573 = vmatmul.mubr.msk.bf16.vlgmr.msra.gmra.mrb[0].mxu0 %vm232_vm0, %v2231_v17  ;;  %v1799_v50 = vld [vmem:[#allocation8 + $0x74] ss:$8 sps:$4 sm:$0xff]   ;;  %v1804_v53 = vld [vmem:[#allocation8 + $0x70] ss:$8 sps:$4 sm:$0xff]   ;;  %v1797_v56 = vld [vmem:[#allocation8 + $0x224] ss:$8 sps:$4 sm:$0xff]  }
  0x68   :  { %278 = vmatpush1.bf16.msra.mxu0 %v1559_v19  ;;  %309 = vmatprep.mubr.bf16.mxu0 %v2128_v0  ;;  %v1791_v52 = vld [vmem:[#allocation8 + $0x214] ss:$8 sps:$4 sm:$0xff]   ;;  %v1789_v55 = vld [vmem:[#allocation8 + $0x210] ss:$8 sps:$4 sm:$0xff]   ;;  %v1810_v57 = vld [vmem:[#allocation8 + $0x80] ss:$8 sps:$4 sm:$0xff]  }
  0x69   :  { %279 = vmatprep.subr.bf16.mxu0 %v1568_v20  ;;  %1201 = vmatpush1.bf16.msra.mxu1 %v1777_v29  ;;  %v1811_v58 = vld [vmem:[#allocation8 + $0x94] ss:$8 sps:$4 sm:$0xff]   ;;  %v1795_v59 = vld [vmem:[#allocation8 + $0x220] ss:$8 sps:$4 sm:$0xff]   ;;  %v1816_v61 = vld [vmem:[#allocation8 + $0x90] ss:$8 sps:$4 sm:$0xff]  }
  0x6a   :  { %1202 = vmatprep.subr.bf16.mxu1 %v1778_v30  ;;  %v1803_v60 = vld [vmem:[#allocation8 + $0x234] ss:$8 sps:$4 sm:$0xff]   ;;  %v1817_v62 = vld [vmem:[#allocation8 + $0xa4] ss:$8 sps:$4 sm:$0xff]   ;;  %v1801_v63 = vld [vmem:[#allocation8 + $0x230] ss:$8 sps:$4 sm:$0xff]  }
  0x6b   :  { %v1822_v1 = vld [vmem:[#allocation8 + $0xa0] ss:$8 sps:$4 sm:$0xff]   ;;  %v1823_v2 = vld [vmem:[#allocation8 + $0xb4] ss:$8 sps:$4 sm:$0xff]   ;;  %v1828_v5 = vld [vmem:[#allocation8 + $0xb0] ss:$8 sps:$4 sm:$0xff]  }
  0x6c   :  { %280 = vmatpush1.bf16.msra.mxu0 %v1567_v25  ;;  %v1807_v3 = vld [vmem:[#allocation8 + $0x240] ss:$8 sps:$4 sm:$0xff]   ;;  %v1815_v4 = vld [vmem:[#allocation8 + $0x254] ss:$8 sps:$4 sm:$0xff]   ;;  %v1829_v6 = vld [vmem:[#allocation8 + $0xc4] ss:$8 sps:$4 sm:$0xff]  }
  0x6d   :  { %318 = vmatprep.subr.bf16.mxu0 %v1562_v27  ;;  %1203 = vmatpush1.bf16.msra.mxu1 %v1780_v33  ;;  %v1813_v7 = vld [vmem:[#allocation8 + $0x250] ss:$8 sps:$4 sm:$0xff]   ;;  %v1821_v8 = vld [vmem:[#allocation8 + $0x264] ss:$8 sps:$4 sm:$0xff]   ;;  %v1834_v9 = vld [vmem:[#allocation8 + $0xc0] ss:$8 sps:$4 sm:$0xff]  }
  0x6e   :  { %1204 = vmatprep.subr.bf16.mxu1 %v1781_v36  ;;  %v1835_v10 = vld [vmem:[#allocation8 + $0xd4] ss:$8 sps:$4 sm:$0xff]   ;;  %v1819_v11 = vld [vmem:[#allocation8 + $0x260] ss:$8 sps:$4 sm:$0xff]   ;;  %v1840_v13 = vld [vmem:[#allocation8 + $0xd0] ss:$8 sps:$4 sm:$0xff]  }
  0x6f   :  { %1574 = vmatmul.mubr.msk.bf16.vlgmr.msra.gmra.mrb[4].mxu0 %vm232_vm0, %v2231_v17  ;;  %v1827_v12 = vld [vmem:[#allocation8 + $0x274] ss:$8 sps:$4 sm:$0xff]   ;;  %v1825_v14 = vld [vmem:[#allocation8 + $0x270] ss:$8 sps:$4 sm:$0xff]   ;;  %v1833_v15 = vld [vmem:[#allocation8 + $0x284] ss:$8 sps:$4 sm:$0xff]  }
  0x70   :  { %319 = vmatpush1.bf16.msra.mxu0 %v1561_v31  ;;  %350 = vmatprep.mubr.bf16.mxu0 %v2128_v0  ;;  %v1831_v16 = vld [vmem:[#allocation8 + $0x280] ss:$8 sps:$4 sm:$0xff]   ;;  %v1837_v18 = vld [vmem:[#allocation8 + $0x290] ss:$8 sps:$4 sm:$0xff]   ;;  %v1841_v19 = vld [vmem:[#allocation8 + $0xe4] ss:$8 sps:$4 sm:$0xff]  }
  0x71   :  { %320 = vmatprep.subr.bf16.mxu0 %v1570_v32  ;;  %1205 = vmatpush1.bf16.msra.mxu1 %v1786_v41  ;;  %v1845_v20 = vld [vmem:[#allocation8 + $0x2a4] ss:$8 sps:$4 sm:$0xff]   ;;  %v1843_v21 = vld [vmem:[#allocation8 + $0x2a0] ss:$8 sps:$4 sm:$0xff]   ;;  %v1847_v23 = vld [vmem:[#allocation8 + $0xf4] ss:$8 sps:$4 sm:$0xff]  }
  0x72   :  { %1206 = vmatprep.subr.bf16.mxu1 %v1787_v42  ;;  %v1846_v22 = vld [vmem:[#allocation8 + $0xe0] ss:$8 sps:$4 sm:$0xff]   ;;  %v1851_v24 = vld [vmem:[#allocation8 + $0x2b4] ss:$8 sps:$4 sm:$0xff]   ;;  %v1849_v25 = vld [vmem:[#allocation8 + $0x2b0] ss:$8 sps:$4 sm:$0xff]  }
  0x73   :  { %v1852_v26 = vld [vmem:[#allocation8 + $0xf0] ss:$8 sps:$4 sm:$0xff]   ;;  %v1855_v27 = vld [vmem:[#allocation8 + $0x104] ss:$8 sps:$4 sm:$0xff]   ;;  %v1856_v29 = vld [vmem:[#allocation8 + $0x2c0] ss:$8 sps:$4 sm:$0xff]  }
  0x74   :  { %321 = vmatpush1.bf16.msra.mxu0 %v1569_v37  ;;  %v1858_v28 = vld [vmem:[#allocation8 + $0x2c4] ss:$8 sps:$4 sm:$0xff]   ;;  %v1864_v30 = vld [vmem:[#allocation8 + $0x2d4] ss:$8 sps:$4 sm:$0xff]   ;;  %v1862_v31 = vld [vmem:[#allocation8 + $0x2d0] ss:$8 sps:$4 sm:$0xff]   ;;  %v112_v37 = vlaneseq }
  0x75   :  { %359 = vmatprep.subr.bf16.mxu0 %v1564_v39  ;;  %1207 = vmatpush1.bf16.msra.mxu1 %v1792_v45  ;;  %v1870_v32 = vld [vmem:[#allocation8 + $0x2e4] ss:$8 sps:$4 sm:$0xff]   ;;  %v1868_v33 = vld [vmem:[#allocation8 + $0x2e0] ss:$8 sps:$4 sm:$0xff]   ;;  %v1876_v34 = vld [vmem:[#allocation8 + $0x2f4] ss:$8 sps:$4 sm:$0xff]  }
  0x76   :  { %1208 = vmatprep.subr.bf16.mxu1 %v1793_v46  ;;  %v1874_v35 = vld [vmem:[#allocation8 + $0x2f0] ss:$8 sps:$4 sm:$0xff]   ;;  %v1882_v36 = vld [vmem:[#allocation8 + $0x304] ss:$8 sps:$4 sm:$0xff]   ;;  %v2244_v38 = vshrl.u32 %v112_v37, 7 }
  0x77   :  { %1575 = vmatmul.mubr.msk.bf16.vlgmr.msra.gmra.mrb[8].mxu0 %vm232_vm0, %v2231_v17  ;;  %v2247_v40 = vld [vmem:[#allocation7] sm:$0xff]  ;;  %v1889_v37 = vld [vmem:[#allocation8 + $0x160] ss:$8 sps:$4 sm:$0xff]  }
  0x78   :  { %360 = vmatpush1.bf16.msra.mxu0 %v1563_v43  ;;  %391 = vmatprep.mubr.bf16.mxu0 %v2128_v0  ;;  %v1809_v0 = vld [vmem:[#allocation8 + $0x244] ss:$8 sps:$4 sm:$0xff]   ;;  %v114_v39 = vsub.s32 0, %v2244_v38  ;;  %v118_v41 = vsub.s32 1, %v2244_v38 }
  0x79   :  { %361 = vmatprep.subr.bf16.mxu0 %v1572_v44  ;;  %1209 = vmatpush1.bf16.msra.mxu1 %v1798_v49  ;;  %v126_v49 = vsub.s32 3, %v2244_v38 }
  0x7a   :  { %1210 = vmatprep.subr.bf16.mxu1 %v1799_v50  ;;  %v115_v42 = vrot.slane %v2247_v40, %v114_v39  ;;  %v119_v43 = vrot.slane %v2247_v40, %v118_v41 }
  0x7c   :  { %362 = vmatpush1.bf16.msra.mxu0 %v1571_v47 }
  0x7d   :  { %1278 = vmatprep.subr.bf16.mxu0 %v1785_v48  ;;  %1211 = vmatpush1.bf16.msra.mxu1 %v1804_v53 }
  0x7e   :  { %1212 = vmatprep.subr.bf16.mxu1 %v1805_v54  ;;  %v1853_v54 = vld [vmem:[#allocation8 + $0x100] ss:$8 sps:$4 sm:$0xff]  }
  0x7f   :  { %1576 = vmatmul.mubr.msk.bf16.vlgmr.msra.gmra.mrb[12].mxu0 %vm232_vm0, %v2231_v17  ;;  %v1839_v17 = vld [vmem:[#allocation8 + $0x294] ss:$8 sps:$4 sm:$0xff]  }
  0x80   :  { %1279 = vmatpush1.bf16.msra.mxu0 %v1783_v51 }
  0x81   :  { %1280 = vmatprep.subr.bf16.mxu0 %v1791_v52  ;;  %1213 = vmatpush1.bf16.msra.mxu1 %v1810_v57  ;;  %v1861_v57 = vld [vmem:[#allocation8 + $0x114] ss:$8 sps:$4 sm:$0xff]  }
  0x82   :  { %1214 = vmatprep.subr.bf16.mxu1 %v1811_v58 }
  0x84   :  { %1281 = vmatpush1.bf16.msra.mxu0 %v1789_v55  ;;  %v127_v55 = vrot.slane %v2247_v40, %v126_v49  ;;  %v1906_v49 = vld [vmem:[#allocation8 + $0x344] ss:$8 sps:$4 sm:$0xff]  }
  0x85   :  { %1282 = vmatprep.subr.bf16.mxu0 %v1797_v56  ;;  %1215 = vmatpush1.bf16.msra.mxu1 %v1816_v61 }
  0x86   :  { %1216 = vmatprep.subr.bf16.mxu1 %v1817_v62 }
  0x88   :  { %1283 = vmatpush1.bf16.msra.mxu0 %v1795_v59 }
  0x89   :  { %1284 = vmatprep.subr.bf16.mxu0 %v1803_v60  ;;  %1217 = vmatpush1.bf16.msra.mxu1 %v1822_v1  ;;  %v130_v60 = vsub.s32 4, %v2244_v38 }
  0x8a   :  { %1218 = vmatprep.subr.bf16.mxu1 %v1823_v2  ;;  %v1867_v2 = vld [vmem:[#allocation8 + $0x124] ss:$8 sps:$4 sm:$0xff]  }
  0x8c   :  { %1285 = vmatpush1.bf16.msra.mxu0 %v1801_v63  ;;  %v1859_v63 = vld [vmem:[#allocation8 + $0x110] ss:$8 sps:$4 sm:$0xff]  }
  0x8d   :  { %1286 = vmatprep.subr.bf16.mxu0 %v1809_v0  ;;  %1219 = vmatpush1.bf16.msra.mxu1 %v1828_v5  ;;  %v134_v0 = vsub.s32 5, %v2244_v38 }
  0x8e   :  { %1220 = vmatprep.subr.bf16.mxu1 %v1829_v6  ;;  %v1865_v6 = vld [vmem:[#allocation8 + $0x120] ss:$8 sps:$4 sm:$0xff]  }
  0x90   :  { %1287 = vmatpush1.bf16.msra.mxu0 %v1807_v3 }
  0x91   :  { %1288 = vmatprep.subr.bf16.mxu0 %v1815_v4  ;;  %1221 = vmatpush1.bf16.msra.mxu1 %v1834_v9  ;;  %v131_v4 = vrot.slane %v2247_v40, %v130_v60  ;;  %v1916_v60 = vld [vmem:[#allocation8 + $0x360] ss:$8 sps:$4 sm:$0xff]  }
  0x92   :  { %1222 = vmatprep.subr.bf16.mxu1 %v1835_v10 }
  0x94   :  { %1289 = vmatpush1.bf16.msra.mxu0 %v1813_v7  ;;  %v135_v7 = vrot.slane %v2247_v40, %v134_v0  ;;  %v1922_v0 = vld [vmem:[#allocation8 + $0x370] ss:$8 sps:$4 sm:$0xff]  }
  0x95   :  { %1290 = vmatprep.subr.bf16.mxu0 %v1821_v8  ;;  %1223 = vmatpush1.bf16.msra.mxu1 %v1840_v13  ;;  %v1873_v8 = vld [vmem:[#allocation8 + $0x134] ss:$8 sps:$4 sm:$0xff]  }
  0x96   :  { %1224 = vmatprep.subr.bf16.mxu1 %v1841_v19 }
  0x98   :  { %1291 = vmatpush1.bf16.msra.mxu0 %v1819_v11 }
  0x99   :  { %1292 = vmatprep.subr.bf16.mxu0 %v1827_v12  ;;  %1225 = vmatpush1.bf16.msra.mxu1 %v1846_v22  ;;  %v1880_v22 = vld [vmem:[#allocation8 + $0x300] ss:$8 sps:$4 sm:$0xff]  }
  0x9a   :  { %1226 = vmatprep.subr.bf16.mxu1 %v1847_v23 }
  0x9c   :  { %1293 = vmatpush1.bf16.msra.mxu0 %v1825_v14  ;;  %v1871_v14 = vld [vmem:[#allocation8 + $0x130] ss:$8 sps:$4 sm:$0xff]  }
  0x9d   :  { %1294 = vmatprep.subr.bf16.mxu0 %v1833_v15  ;;  %1227 = vmatpush1.bf16.msra.mxu1 %v1852_v26  ;;  %v142_v15 = vsub.s32 7, %v2244_v38  ;;  %v1888_v26 = vld [vmem:[#allocation8 + $0x314] ss:$8 sps:$4 sm:$0xff]  }
  0x9e   :  { %1237 = vmatprep.subr.bf16.mxu1 %v1855_v27 }
  0x9f   :  { %v143_v23 = vrot.slane %v2247_v40, %v142_v15 }
  0xa0   :  { %1295 = vmatpush1.bf16.msra.mxu0 %v1831_v16 }
  0xa1   :  { %1296 = vmatprep.subr.bf16.mxu0 %v1839_v17 }
  0xa4   :  { %1297 = vmatpush1.bf16.msra.mxu0 %v1837_v18  ;;  %v1879_v18 = vld [vmem:[#allocation8 + $0x144] ss:$8 sps:$4 sm:$0xff]  }
  0xa5   :  { %1298 = vmatprep.subr.bf16.mxu0 %v1845_v20 }
  0xa8   :  { %1299 = vmatpush1.bf16.msra.mxu0 %v1843_v21  ;;  %v1877_v21 = vld [vmem:[#allocation8 + $0x140] ss:$8 sps:$4 sm:$0xff]  }
  0xa9   :  { %1300 = vmatprep.subr.bf16.mxu0 %v1851_v24 }
  0xac   :  { %1301 = vmatpush1.bf16.msra.mxu0 %v1849_v25  ;;  %v1885_v25 = vld [vmem:[#allocation8 + $0x154] ss:$8 sps:$4 sm:$0xff]  }
  0xad   :  { %1302 = vmatprep.subr.bf16.mxu0 %v1858_v28 }
  0xb0   :  { %1303 = vmatpush1.bf16.msra.mxu0 %v1856_v29  ;;  %v1883_v29 = vld [vmem:[#allocation8 + $0x150] ss:$8 sps:$4 sm:$0xff]  }
  0xb1   :  { %1304 = vmatprep.subr.bf16.mxu0 %v1864_v30  ;;  %v1886_v30 = vld [vmem:[#allocation8 + $0x310] ss:$8 sps:$4 sm:$0xff]  }
  0xb4   :  { %1305 = vmatpush1.bf16.msra.mxu0 %v1862_v31 }
  0xb5   :  { %1306 = vmatprep.subr.bf16.mxu0 %v1870_v32 }
  0xb8   :  { %1307 = vmatpush1.bf16.msra.mxu0 %v1868_v33  ;;  %v1891_v33 = vld [vmem:[#allocation8 + $0x164] ss:$8 sps:$4 sm:$0xff]  }
  0xb9   :  { %1308 = vmatprep.subr.bf16.mxu0 %v1876_v34  ;;  %v1894_v34 = vld [vmem:[#allocation8 + $0x324] ss:$8 sps:$4 sm:$0xff]  }
  0xbc   :  { %1309 = vmatpush1.bf16.msra.mxu0 %v1874_v35 }
  0xbd   :  { %1319 = vmatprep.subr.bf16.mxu0 %v1882_v36 }
 0x13a   :  { %v270_v44 = vpop.f32.mrb[0].mxu0 }
 0x13b   :  { %v271_v45 = vadd.f32 %v270_v44, %v115_v42  ;;  %v272_v46 = vpop.f32.mrb[1].mxu0  ;;  %v1892_v42 = vld [vmem:[#allocation8 + $0x320] ss:$8 sps:$4 sm:$0xff]   ;;  %v1897_v44 = vld [vmem:[#allocation8 + $0x174] ss:$8 sps:$4 sm:$0xff]  }
 0x13c   :  { %v273_v47 = vadd.f32 %v272_v46, %v119_v43  ;;  %v274_v48 = vpop.f32.mrb[2].mxu0  ;;  %v1895_v46 = vld [vmem:[#allocation8 + $0x170] ss:$8 sps:$4 sm:$0xff]  }
 0x13d   :  { %v400_v50 = vmax.f32 %v271_v45, 0.0  ;;  %v275_v51 = vpop.f32.mrb[3].mxu0  ;;  %v1900_v45 = vld [vmem:[#allocation8 + $0x334] ss:$8 sps:$4 sm:$0xff]   ;;  %v1903_v48 = vld [vmem:[#allocation8 + $0x184] ss:$8 sps:$4 sm:$0xff]  }
 0x13e   :  { %v401_v52 = vmax.f32 %v273_v47, 0.0  ;;  %v1898_v47 = vld [vmem:[#allocation8 + $0x330] ss:$8 sps:$4 sm:$0xff]   ;;  %v1904_v51 = vld [vmem:[#allocation8 + $0x340] ss:$8 sps:$4 sm:$0xff]  }
 0x13f   :  { %v408_v56 = vpack.c.bf16 %v400_v50, %v400_v50  ;;  %v1901_v50 = vld [vmem:[#allocation8 + $0x180] ss:$8 sps:$4 sm:$0xff]  }
 0x140   :  { %v409_v53 = vpack.c.bf16 %v401_v52, %v401_v52  ;;  %v1909_v52 = vld [vmem:[#allocation8 + $0x194] ss:$8 sps:$4 sm:$0xff]  }
 0x142   :  { %v2258_v58 = vpop.f32.mrb[4].mxu0  ;;  %1228 = vmatprep.mubr.bf16.mxu1 %v409_v53  ;;  %v1912_v53 = vld [vmem:[#allocation8 + $0x354] ss:$8 sps:$4 sm:$0xff]  }
 0x143   :  { %v313_v59 = vpop.f32.mrb[5].mxu0  ;;  %1229 = vmatmul.mubr.bf16.vlgmr.msra.gmra.mrb[0].mxu1 %v408_v56  ;;  %v1915_v56 = vld [vmem:[#allocation8 + $0x1a4] ss:$8 sps:$4 sm:$0xff]  }
 0x144   :  { %v314_v61 = vadd.f32 %v313_v59, %v127_v55  ;;  %1238 = vmatpush1.bf16.msra.mxu1 %v1853_v54  ;;  %v315_v62 = vpop.f32.mrb[6].mxu0  ;;  %v1907_v54 = vld [vmem:[#allocation8 + $0x190] ss:$8 sps:$4 sm:$0xff]   ;;  %v1913_v59 = vld [vmem:[#allocation8 + $0x1a0] ss:$8 sps:$4 sm:$0xff]  }
 0x145   :  { %v316_v1 = vpop.f32.mrb[7].mxu0  ;;  %1239 = vmatprep.subr.bf16.mxu1 %v1861_v57  ;;  %v1910_v55 = vld [vmem:[#allocation8 + $0x350] ss:$8 sps:$4 sm:$0xff]   ;;  %v1918_v57 = vld [vmem:[#allocation8 + $0x364] ss:$8 sps:$4 sm:$0xff]  }
 0x146   :  { %v403_v3 = vmax.f32 %v314_v61, 0.0  ;;  %v1921_v61 = vld [vmem:[#allocation8 + $0x1b4] ss:$8 sps:$4 sm:$0xff]   ;;  %v1927_v1 = vld [vmem:[#allocation8 + $0x1c4] ss:$8 sps:$4 sm:$0xff]  }
 0x147   :  { %v1924_v62 = vld [vmem:[#allocation8 + $0x374] ss:$8 sps:$4 sm:$0xff]  }
 0x148   :  { %v411_v5 = vpack.c.bf16 %v403_v3, %v403_v3  ;;  %1240 = vmatpush1.bf16.msra.mxu1 %v1859_v63  ;;  %v1919_v63 = vld [vmem:[#allocation8 + $0x1b0] ss:$8 sps:$4 sm:$0xff]   ;;  %v1925_v3 = vld [vmem:[#allocation8 + $0x1c0] ss:$8 sps:$4 sm:$0xff]  }
 0x149   :  { %1241 = vmatprep.subr.bf16.mxu1 %v1867_v2  ;;  %v1930_v2 = vld [vmem:[#allocation8 + $0x384] ss:$8 sps:$4 sm:$0xff]  }
 0x14a   :  { %v352_v9 = vpop.f32.mrb[8].mxu0  ;;  %1269 = vmatprep.mubr.bf16.mxu1 %v411_v5  ;;  %v122_v5 = vsub.s32 2, %v2244_v38 }
 0x14b   :  { %v353_v10 = vadd.f32 %v352_v9, %v131_v4  ;;  %v354_v11 = vpop.f32.mrb[9].mxu0  ;;  %v1928_v4 = vld [vmem:[#allocation8 + $0x380] ss:$8 sps:$4 sm:$0xff]   ;;  %v1934_v9 = vld [vmem:[#allocation8 + $0x390] ss:$8 sps:$4 sm:$0xff]  }
 0x14c   :  { %v355_v12 = vadd.f32 %v354_v11, %v135_v7  ;;  %1242 = vmatpush1.bf16.msra.mxu1 %v1865_v6  ;;  %v356_v13 = vpop.f32.mrb[10].mxu0  ;;  %v1933_v6 = vld [vmem:[#allocation8 + $0x1d4] ss:$8 sps:$4 sm:$0xff]   ;;  %v1939_v11 = vld [vmem:[#allocation8 + $0x1e4] ss:$8 sps:$4 sm:$0xff]  }
 0x14d   :  { %v404_v16 = vmax.f32 %v353_v10, 0.0  ;;  %v357_v17 = vpop.f32.mrb[11].mxu0  ;;  %1243 = vmatprep.subr.bf16.mxu1 %v1873_v8  ;;  %v1936_v7 = vld [vmem:[#allocation8 + $0x394] ss:$8 sps:$4 sm:$0xff]   ;;  %v1931_v8 = vld [vmem:[#allocation8 + $0x1d0] ss:$8 sps:$4 sm:$0xff]   ;;  %v123_v10 = vrot.slane %v2247_v40, %v122_v5 }
 0x14e   :  { %v405_v19 = vmax.f32 %v355_v12, 0.0  ;;  %v1942_v12 = vld [vmem:[#allocation8 + $0x3a4] ss:$8 sps:$4 sm:$0xff]   ;;  %v1937_v13 = vld [vmem:[#allocation8 + $0x1e0] ss:$8 sps:$4 sm:$0xff]  }
 0x14f   :  { %v412_v24 = vpack.c.bf16 %v404_v16, %v404_v16  ;;  %v312_v15 = vadd.f32 %v2258_v58, %v123_v10  ;;  %v1945_v16 = vld [vmem:[#allocation8 + $0x1f4] ss:$8 sps:$4 sm:$0xff]  }
 0x150   :  { %v413_v20 = vpack.c.bf16 %v405_v19, %v405_v19  ;;  %1244 = vmatpush1.bf16.msra.mxu1 %v1871_v14  ;;  %v1940_v14 = vld [vmem:[#allocation8 + $0x3a0] ss:$8 sps:$4 sm:$0xff]   ;;  %v1948_v17 = vld [vmem:[#allocation8 + $0x3b4] ss:$8 sps:$4 sm:$0xff]   ;;  %v1946_v19 = vld [vmem:[#allocation8 + $0x3b0] ss:$8 sps:$4 sm:$0xff]  }
 0x151   :  { %1245 = vmatprep.subr.bf16.mxu1 %v1879_v18  ;;  %v1943_v18 = vld [vmem:[#allocation8 + $0x1f0] ss:$8 sps:$4 sm:$0xff]   ;;  %v1954_v58 = vld [vmem:[#allocation8 + $0x3d4] ss:$8 sps:$4 sm:$0xff]  }
 0x152   :  { %1310 = vmatprep.mubr.bf16.mxu0 %v413_v20  ;;  %v2266_v27 = vpop.f32.mrb[12].mxu0  ;;  %v402_v20 = vmax.f32 %v312_v15, 0.0 }
 0x153   :  { %1311 = vmatmul.mubr.bf16.vlgmr.msra.gmra.mrb[16].mxu0 %v412_v24  ;;  %v395_v28 = vpop.f32.mrb[13].mxu0  ;;  %v1962_v24 = vld [vmem:[#allocation10] sm:$0xff]  }
 0x154   :  { %1246 = vmatpush1.bf16.msra.mxu1 %v1877_v21  ;;  %1320 = vmatpush1.bf16.msra.mxu0 %v1880_v22  ;;  %v396_v31 = vadd.f32 %v395_v28, %v143_v23  ;;  %v397_v32 = vpop.f32.mrb[14].mxu0  ;;  %v1951_v21 = vld [vmem:[#allocation8 + $0x3c4] ss:$8 sps:$4 sm:$0xff]   ;;  %v1949_v23 = vld [vmem:[#allocation8 + $0x3c0] ss:$8 sps:$4 sm:$0xff]  }
 0x155   :  { %1247 = vmatprep.subr.bf16.mxu1 %v1885_v25  ;;  %1321 = vmatprep.subr.bf16.mxu0 %v1888_v26  ;;  %v398_v35 = vpop.f32.mrb[15].mxu0  ;;  %v1961_v22 = vld [vmem:[#allocation10 + $0x40] sm:$0xff]   ;;  %v410_v25 = vpack.c.bf16 %v402_v20, %v402_v20  ;;  %v138_v26 = vsub.s32 6, %v2244_v38  ;;  %v1963_v28 = vld [vmem:[#allocation10 + $0x48] sm:$0xff]   ;;  %v1705_v38 = vld [vmem:[%s2302_s6] ss:$0 sm:$0xff] }
 0x156   :  { %v407_v36 = vmax.f32 %v396_v31, 0.0  ;;  %v1957_v32 = vld [vmem:[#allocation8 + $0x3e4] ss:$8 sps:$4 sm:$0xff]   ;;  %v1960_v35 = vld [vmem:[#allocation8 + $0x3f4] ss:$8 sps:$4 sm:$0xff]  }
 0x157   :  { %v139_v31 = vrot.slane %v2247_v40, %v138_v26  ;;  %v1967_v40 = vld [vmem:[#allocation10 + $0x58] sm:$0xff]  }
 0x158   :  { %1248 = vmatpush1.bf16.msra.mxu1 %v1883_v29  ;;  %1322 = vmatpush1.bf16.msra.mxu0 %v1886_v30  ;;  %v415_v43 = vpack.c.bf16 %v407_v36, %v407_v36  ;;  %v1952_v29 = vld [vmem:[#allocation8 + $0x3d0] ss:$8 sps:$4 sm:$0xff]   ;;  %v1964_v30 = vld [vmem:[#allocation10 + $0x8] sm:$0xff]  }
 0x159   :  { %1249 = vmatprep.subr.bf16.mxu1 %v1891_v33  ;;  %1323 = vmatprep.subr.bf16.mxu0 %v1894_v34  ;;  %v1955_v33 = vld [vmem:[#allocation8 + $0x3e0] ss:$8 sps:$4 sm:$0xff]   ;;  %v394_v34 = vadd.f32 %v2266_v27, %v139_v31  ;;  %v1958_v36 = vld [vmem:[#allocation8 + $0x3f0] ss:$8 sps:$4 sm:$0xff]  }
 0x15a   :  { %1351 = vmatprep.mubr.bf16.mxu0 %v415_v43  ;;  %v1965_v43 = vld [vmem:[#allocation10 + $0x50] sm:$0xff]   ;;  %v1971_v27 = vld [vmem:[#allocation10 + $0x68] sm:$0xff]  }
 0x15c   :  { %1250 = vmatpush1.bf16.msra.mxu1 %v1889_v37  ;;  %1324 = vmatpush1.bf16.msra.mxu0 %v1892_v42  ;;  %v406_v37 = vmax.f32 %v394_v34, 0.0 }
 0x15d   :  { %1251 = vmatprep.subr.bf16.mxu1 %v1897_v44  ;;  %1325 = vmatprep.subr.bf16.mxu0 %v1900_v45  ;;  %v1966_v44 = vld [vmem:[#allocation10 + $0x10] sm:$0xff]   ;;  %v1968_v45 = vld [vmem:[#allocation10 + $0x18] sm:$0xff]  }
 0x15e   :  { %v414_v42 = vpack.c.bf16 %v406_v37, %v406_v37 }
 0x160   :  { %1252 = vmatpush1.bf16.msra.mxu1 %v1895_v46  ;;  %1326 = vmatpush1.bf16.msra.mxu0 %v1898_v47  ;;  %v1969_v46 = vld [vmem:[#allocation10 + $0x60] sm:$0xff]  }
 0x161   :  { %1253 = vmatprep.subr.bf16.mxu1 %v1903_v48  ;;  %1327 = vmatprep.subr.bf16.mxu0 %v1906_v49  ;;  %v1970_v47 = vld [vmem:[#allocation10 + $0x20] sm:$0xff]   ;;  %v1972_v48 = vld [vmem:[#allocation10 + $0x28] sm:$0xff]   ;;  %v1973_v49 = vld [vmem:[#allocation10 + $0x70] sm:$0xff]  }
 0x164   :  { %1254 = vmatpush1.bf16.msra.mxu1 %v1901_v50  ;;  %1328 = vmatpush1.bf16.msra.mxu0 %v1904_v51  ;;  %v1974_v50 = vld [vmem:[#allocation10 + $0x30] sm:$0xff]   ;;  %v1975_v51 = vld [vmem:[#allocation10 + $0x78] sm:$0xff]  }
 0x165   :  { %1255 = vmatprep.subr.bf16.mxu1 %v1909_v52  ;;  %1329 = vmatprep.subr.bf16.mxu0 %v1912_v53  ;;  %v1976_v52 = vld [vmem:[#allocation10 + $0x38] sm:$0xff]  }
 0x168   :  { %1256 = vmatpush1.bf16.msra.mxu1 %v1907_v54  ;;  %1330 = vmatpush1.bf16.msra.mxu0 %v1910_v55 }
 0x169   :  { %1257 = vmatprep.subr.bf16.mxu1 %v1915_v56  ;;  %1331 = vmatprep.subr.bf16.mxu0 %v1918_v57  ;;  %v544_v57 = vld [vmem:[%s2300_s4] sm:$0x3] }
 0x16c   :  { %1258 = vmatpush1.bf16.msra.mxu1 %v1913_v59  ;;  %1332 = vmatpush1.bf16.msra.mxu0 %v1916_v60  ;;  %v549_v59 = vrot.slane %v544_v57, %v114_v39  ;;  %v553_v60 = vrot.slane %v544_v57, %v118_v41 }
 0x16d   :  { %1259 = vmatprep.subr.bf16.mxu1 %v1921_v61  ;;  %1333 = vmatprep.subr.bf16.mxu0 %v1924_v62 }
 0x170   :  { %1260 = vmatpush1.bf16.msra.mxu1 %v1919_v63  ;;  %1334 = vmatpush1.bf16.msra.mxu0 %v1922_v0 }
 0x171   :  { %1261 = vmatprep.subr.bf16.mxu1 %v1927_v1  ;;  %1335 = vmatprep.subr.bf16.mxu0 %v1930_v2 }
 0x174   :  { %1262 = vmatpush1.bf16.msra.mxu1 %v1925_v3  ;;  %1336 = vmatpush1.bf16.msra.mxu0 %v1928_v4 }
 0x175   :  { %1263 = vmatprep.subr.bf16.mxu1 %v1933_v6  ;;  %1337 = vmatprep.subr.bf16.mxu0 %v1936_v7 }
 0x178   :  { %1264 = vmatpush1.bf16.msra.mxu1 %v1931_v8  ;;  %1338 = vmatpush1.bf16.msra.mxu0 %v1934_v9 }
 0x179   :  { %1265 = vmatprep.subr.bf16.mxu1 %v1939_v11  ;;  %1339 = vmatprep.subr.bf16.mxu0 %v1942_v12 }
 0x17c   :  { %1266 = vmatpush1.bf16.msra.mxu1 %v1937_v13  ;;  %1340 = vmatpush1.bf16.msra.mxu0 %v1940_v14 }
 0x17d   :  { %1267 = vmatprep.subr.bf16.mxu1 %v1945_v16  ;;  %1341 = vmatprep.subr.bf16.mxu0 %v1948_v17 }
 0x180   :  { %1268 = vmatpush1.bf16.msra.mxu1 %v1943_v18  ;;  %1342 = vmatpush1.bf16.msra.mxu0 %v1946_v19 }
 0x181   :  { %1343 = vmatprep.subr.bf16.mxu0 %v1951_v21  ;;  %1722 = vmatprep.subr.bf16.mxu1 %v1961_v22 }
 0x183   :  { %1270 = vmatmul.mubr.bf16.vlgmr.msra.gmra.mrb[0].mxu1 %v410_v25 }
 0x184   :  { %1344 = vmatpush1.bf16.msra.mxu0 %v1949_v23  ;;  %1723 = vmatpush3.bf16.msra.mxu1 %v1962_v24 }
 0x185   :  { %1345 = vmatprep.subr.bf16.mxu0 %v1954_v58  ;;  %1724 = vmatprep.subr.bf16.mxu1 %v1963_v28 }
 0x188   :  { %1346 = vmatpush1.bf16.msra.mxu0 %v1952_v29  ;;  %1725 = vmatpush3.bf16.msra.mxu1 %v1964_v30 }
 0x189   :  { %1347 = vmatprep.subr.bf16.mxu0 %v1957_v32  ;;  %1726 = vmatprep.subr.bf16.mxu1 %v1965_v43 }
 0x18c   :  { %1348 = vmatpush1.bf16.msra.mxu0 %v1955_v33  ;;  %1727 = vmatpush3.bf16.msra.mxu1 %v1966_v44 }
 0x18d   :  { %1349 = vmatprep.subr.bf16.mxu0 %v1960_v35  ;;  %1728 = vmatprep.subr.bf16.mxu1 %v1967_v40 }
 0x190   :  { %1350 = vmatpush1.bf16.msra.mxu0 %v1958_v36  ;;  %1729 = vmatpush3.bf16.msra.mxu1 %v1968_v45 }
 0x191   :  { %1730 = vmatprep.subr.bf16.mxu1 %v1969_v46 }
 0x193   :  { %1352 = vmatmul.mubr.bf16.vlgmr.msra.gmra.mrb[16].mxu0 %v414_v42 }
 0x194   :  { %1731 = vmatpush3.bf16.msra.mxu1 %v1970_v47 }
 0x195   :  { %1732 = vmatprep.subr.bf16.mxu1 %v1971_v27 }
 0x198   :  { %1733 = vmatpush3.bf16.msra.mxu1 %v1972_v48 }
 0x199   :  { %1734 = vmatprep.subr.bf16.mxu1 %v1973_v49 }
 0x19c   :  { %1735 = vmatpush3.bf16.msra.mxu1 %v1974_v50 }
 0x19d   :  { %1736 = vmatprep.subr.bf16.mxu1 %v1975_v51 }
 0x1a0   :  { %1737 = vmatpush3.bf16.msra.mxu1 %v1976_v52 }
 0x256   :  { %v1271_v53 = vpop.f32.mrb[0].mxu1 }
 0x257   :  { %v1273_v54 = vpop.f32.mrb[1].mxu1  ;;  %v1744_v61 = vadd.f32 %v1271_v53, %v549_v59 }
 0x258   :  { %v1275_v55 = vpop.f32.mrb[2].mxu1  ;;  %v1746_v62 = vadd.f32 %v1273_v54, %v553_v60 }
 0x259   :  { %v1276_v56 = vpop.f32.mrb[3].mxu1 }
 0x266   :  { %v1353_v63 = vpop.f32.mrb[16].mxu0 }
 0x267   :  { %v1745_v0 = vadd.f32 %v1744_v61, %v1353_v63  ;;  %v1355_v1 = vpop.f32.mrb[17].mxu0 }
 0x268   :  { %v1747_v2 = vadd.f32 %v1746_v62, %v1355_v1  ;;  %v1357_v3 = vpop.f32.mrb[18].mxu0 }
 0x269   :  { %v1360_v4 = vmax.f32 %v1745_v0, 0.0  ;;  %v1358_v5 = vpop.f32.mrb[19].mxu0 }
 0x26a   :  { %v1361_v6 = vmax.f32 %v1747_v2, 0.0 }
 0x26b   :  { %v1362_v8 = vpack.c.bf16 %v1360_v4, %v1360_v4 }
 0x26c   :  { %v1363_v7 = vpack.c.bf16 %v1361_v6, %v1361_v6 }
 0x26e   :  { %1531 = vmatprep.mubr.bf16.mxu1 %v1363_v7 }
 0x26f   :  { %1532 = vmatmul.mubr.bf16.vlgmr.msra.gmra.mrb[4].mxu1 %v1362_v8 }
 0x342   :  { %v1738_v9 = vpop.f32.mrb[4].mxu1 }
 0x343   :  { %v1739_v39 = vpop.f32.mrb[5].mxu1 }
 0x344   :  { %v1740_v41 = vadd.f32 %v1739_v39, %v1738_v9  ;;  %v1741_v10 = vpop.f32.mrb[6].mxu1 }
 0x345   :  { %v1742_v11 = vpop.f32.mrb[7].mxu1 }
 0x346   :  { %v1534_v12 = vadd.f32 %v1740_v41, %v1705_v38 }
 0x348   :  { %1539 = vst [vmem:[#allocation11] sm:$0xff] %v1534_v12 }
 0x349   :  { %2098 = shalt.err (!%p2095_p2)
}
 0x34a   :  { %s2099_s6 = scalar_lea.hbm %s2303_s7, 128 }
 0x34b   :  { %p2100_p3 = scmp.ne.s32.totalorder %s2303_s7, %s2099_s6  ;;  %p2103_p4 = scmp.lt.u32.totalorder %s2099_s6, %s2303_s7 }
 0x34d   :  { %p2105_p5 = pnand %p2103_p4, %p2100_p3 }
 0x34f   :  { %2108 = shalt.err (!%p2105_p5)
}
 0x350   :  { %1549 = dma.vmem_to_hbm [thread:$0]  %s1547_s18, 128, %s2303_s7, [#allocation4]  }
 0x351   :  { %2115 = dma.done.wait [#allocation4], 128  }
 0x352   :  { %2116 = vsyncadd [#allocation4], 4294967168 }
 0x353   :  { %1553 = vsyncpa [#allocation3], 1 }
 0x354   :  { %1554 = vsyncpa [#allocation6], 1 }
 0x355   :  { %1555 = vsyncpa [#allocation9], 1 }
 0x356   :  { %1556 = vsyncpa [#allocation4], 1 }

</bundles_post_ra>
